<compile_context>
chip_gen: v7x
topology: tpu7x:2x2x1
jax: 0.10.0
libtpu: 0.0.40
codegen_flags: <defaults>
</compile_context>

<pallas_src>
import functools
import math

import jax
import jax.numpy as jnp
from jax.experimental import pallas as pl
from jax.experimental.pallas import tpu as pltpu

_LOG_EPS = math.log(1e-8)


def _cssae_loss_kernel(
    y_ref,      # [2B, T]    rows 0:B = y_true, B:2B = y_pred
    x_ref,      # [3B, Dp]   rows 0:B = base, B:2B = weather, 2B:3B = weather_shuffled
    w1_ref,     # [2Dp, 2H]  fused first layer: rows 0:Dp base half, Dp:2Dp weather half
    w2_ref,     # [2H, 2H]   block-diagonal fused second layer (MINE | disc), zero padded
    slab_ref,   # [8, 2H]    biases + N=1 output rows (layout in wrapper)
    out_ref,    # [1, 1]     scalar result in SMEM
    *,
    reconstruction_weight, causal_weight,
    mi_weight, adversarial_weight, dcor_weight,
    bf16_matmuls,
):
    f32 = jnp.float32
    B = x_ref.shape[0] // 3
    Dp = x_ref.shape[1]

    def mm(a):  # optional bf16 matmul inputs (accumulation stays f32)
        return a.astype(jnp.bfloat16) if bf16_matmuls else a

    # ---------------- Reconstruction MSE ----------------
    y = y_ref[...].astype(f32)
    diff = y[:B] - y[B:]
    recon_loss = jnp.mean(diff * diff)
    # TODO(synk): at large B reshape y to a lane-dense layout in the wrapper
    # (T=24 only fills 24/128 lanes per vreg).

    # ---------------- Embeddings ----------------
    x = x_ref[...].astype(f32)
    base = x[:B]            # [B, Dp]
    weather = x[B:2 * B]    # [B, Dp]
    wstack = x[B:]          # [2B, Dp] = (weather ; weather_shuffled)

    # ---------------- Fused first layer (MINE ++ discriminator) ----------------
    # dot(concat([base, w], -1), W1) == dot(base, W1_base) + dot(w, W1_weather):
    # no lane concat; the base contribution is computed once and reused.
    w1 = w1_ref[...]
    base_c = jnp.dot(mm(base), mm(w1[:Dp]), preferred_element_type=f32)     # [B, 2H]
    weat_c = jnp.dot(mm(wstack), mm(w1[Dp:]), preferred_element_type=f32)   # [2B, 2H]
    b1 = slab_ref[0:1, :]
    # joint / marginal halves kept as two M=B row sets (no sublane-concat copy)
    h1_j = jnp.maximum(base_c + weat_c[:B] + b1, 0.0)   # [B, 2H]
    h1_m = jnp.maximum(base_c + weat_c[B:] + b1, 0.0)   # [B, 2H]

    # ---------------- Fused block-diagonal second layer ----------------
    # W2bd: mW2 in [0:H,0:H], dW2 in [H:2H,H:H+Hd], rest zero; K = 2H = 128.
    w2 = w2_ref[...]
    b2 = slab_ref[1:2, :]
    h2_j = jnp.maximum(jnp.dot(mm(h1_j), mm(w2), preferred_element_type=f32) + b2, 0.0)
    h2_m = jnp.maximum(jnp.dot(mm(h1_m), mm(w2), preferred_element_type=f32) + b2, 0.0)

    # N=1 output heads: VPU multiply against zero-padded weight rows + lane
    # reduction (no offset-64 lane slices of h2, MXU stays free).
    mw3 = slab_ref[2:3, :]        # mW3^T in cols 0:H, zeros elsewhere
    dw3 = slab_ref[3:4, :]        # dW3^T in cols H:H+Hd, zeros elsewhere
    mb3 = slab_ref[4:5, 0:1]
    db3 = slab_ref[5:6, 0:1]
    joint_scores = jnp.sum(h2_j * mw3, axis=-1, keepdims=True) + mb3   # [B, 1]
    marg_scores = jnp.sum(h2_m * mw3, axis=-1, keepdims=True) + mb3    # [B, 1]
    logits = jnp.sum(h2_j * dw3, axis=-1, keepdims=True) + db3         # [B, 1]

    # ---------------- MINE MI loss ----------------
    # mean(joint) - log(mean(exp(marginal)) + 1e-8); eps folded exactly:
    # log(exp(m)*mean_exp + eps) == logaddexp(m + log(mean_exp), log(eps)).
    m = jnp.max(marg_scores)
    mean_exp = jnp.mean(jnp.exp(marg_scores - m))      # in [1/B, 1], always > 0
    a = m + jnp.log(mean_exp)
    hi = jnp.maximum(a, _LOG_EPS)
    lo = jnp.minimum(a, _LOG_EPS)
    log_mean_exp = hi + jnp.log(1.0 + jnp.exp(lo - hi))
    mi_loss = -(jnp.mean(joint_scores) - log_mean_exp)

    # ---------------- Adversarial encoder loss (real pairs, target 0) ---------
    # BCE(sigmoid(z), 0) == softplus(z); clamp at 100 like torch's clamped log.
    softplus = jnp.maximum(logits, 0.0) + jnp.log(1.0 + jnp.exp(-jnp.abs(logits)))
    adv_loss = jnp.mean(jnp.minimum(softplus, 100.0))

    # ---------------- Distance correlation (Gram form, no diag extraction) ----
    def centered_dist(xm):
        xx = xm * xm
        g = jax.lax.dot_general(xm, xm, (((1,), (1,)), ((), ())),
                                preferred_element_type=f32)            # [B,B] x_i.x_j
        sq_col = jnp.sum(xx, axis=-1, keepdims=True)                   # [B,1] ||x_i||^2
        ones = jnp.ones_like(xm)
        sq_rowm = jax.lax.dot_general(ones, xx, (((1,), (1,)), ((), ())),
                                      preferred_element_type=f32)      # [B,B] ||x_j||^2
        d2 = sq_col + sq_rowm - 2.0 * g
        # TODO(synk): Gram identity can lose precision for nearly identical
        # rows vs the direct (x_i - x_j) form; clamp guards fp-negative values.
        d = jnp.sqrt(jnp.maximum(d2, 0.0))
        row = jnp.mean(d, axis=1, keepdims=True)
        col = jnp.mean(d, axis=0, keepdims=True)
        gm = jnp.mean(d)
        return d - row - col + gm

    cb = centered_dist(base)
    cw = centered_dist(weather)
    # V-statistic dcov^2 is mathematically >= 0; clamp guards fp-negatives only.
    dcov_xy = jnp.sqrt(jnp.maximum(jnp.mean(cb * cw), 0.0))
    dcov_xx = jnp.sqrt(jnp.maximum(jnp.mean(cb * cb), 0.0))
    dcov_yy = jnp.sqrt(jnp.maximum(jnp.mean(cw * cw), 0.0))
    dcor = dcov_xy / (jnp.sqrt(dcov_xx * dcov_yy) + 1e-8)

    # ---------------- Weighted total ----------------
    causal = (mi_weight * mi_loss
              + adversarial_weight * adv_loss
              + dcor_weight * dcor)
    out_ref[0, 0] = reconstruction_weight * recon_loss + causal_weight * causal


def init_linear(key, fan_in, fan_out):
    """PyTorch nn.Linear default init: U(-1/sqrt(fan_in), 1/sqrt(fan_in))."""
    kw, kb = jax.random.split(key)
    bound = 1.0 / jnp.sqrt(jnp.float32(fan_in))
    w = jax.random.uniform(kw, (fan_in, fan_out), jnp.float32, -bound, bound)
    b = jax.random.uniform(kb, (1, fan_out), jnp.float32, -bound, bound)
    return w, b


def make_params(key, base_dim, weather_dim, hidden=64):
    d = base_dim + weather_dim
    keys = jax.random.split(key, 6)
    # MINE: D -> 64 -> 64 -> 1
    mW1, mb1 = init_linear(keys[0], d, hidden)
    mW2, mb2 = init_linear(keys[1], hidden, hidden)
    mW3, mb3 = init_linear(keys[2], hidden, 1)
    # Discriminator: D -> 64 -> 32 -> 1 (dropout layers identity in eval)
    dW1, db1 = init_linear(keys[3], d, hidden)
    dW2, db2 = init_linear(keys[4], hidden, hidden // 2)
    dW3, db3 = init_linear(keys[5], hidden // 2, 1)
    return dict(mW1=mW1, mb1=mb1, mW2=mW2, mb2=mb2, mW3=mW3, mb3=mb3,
                dW1=dW1, db1=db1, dW2=dW2, db2=db2, dW3=dW3, db3=db3)


def cssae_loss(y_true, outputs, params, perm_key,
               reconstruction_weight=1.0, causal_weight=0.1,
               mi_weight=1.0, adversarial_weight=0.5, dcor_weight=0.3,
               bf16_matmuls=False):
    base = outputs["base_embedding"]
    weather = outputs["weather_embedding"]
    y_pred = outputs["total_reconstruction"]
    batch = base.shape[0]
    # In-kernel row slices assume sublane-aligned halves (review correctness note).
    assert batch % 8 == 0, "batch must be a multiple of 8 for this kernel"
    assert y_true.shape == y_pred.shape and weather.shape[0] == batch

    Db = base.shape[1]
    Dw = weather.shape[1]
    Dp = max(Db, Dw)

    # Deterministic permutation (stands in for torch.randperm); shuffled rows
    # are folded into the single stacked embedding operand.
    perm = jax.random.permutation(perm_key, batch)
    base_p = jnp.pad(jnp.asarray(base, jnp.float32), ((0, 0), (0, Dp - Db)))
    weather_p = jnp.pad(jnp.asarray(weather, jnp.float32), ((0, 0), (0, Dp - Dw)))
    x_stack = jnp.concatenate([base_p, weather_p, weather_p[perm]], axis=0)   # [3B, Dp]

    y_stack = jnp.concatenate([jnp.asarray(y_true, jnp.float32),
                               jnp.asarray(y_pred, jnp.float32)], axis=0)     # [2B, T]

    p = params
    H = p["mW2"].shape[0]        # MINE hidden (= disc hidden) = 64
    Hd = p["dW2"].shape[1]       # disc hidden // 2 = 32
    two_h = 2 * H                # fused layer-1 width = 128

    # Fused, split first layer: rows 0:Dp act on base, Dp:2Dp act on weather;
    # columns 0:H = MINE, H:2H = discriminator.  Zero-padded to the common Dp.
    w1b = jnp.concatenate([p["mW1"][:Db], p["dW1"][:Db]], axis=1)             # [Db, 2H]
    w1w = jnp.concatenate([p["mW1"][Db:], p["dW1"][Db:]], axis=1)             # [Dw, 2H]
    w1_fused = jnp.concatenate([jnp.pad(w1b, ((0, Dp - Db), (0, 0))),
                                jnp.pad(w1w, ((0, Dp - Dw), (0, 0)))], axis=0)  # [2Dp, 2H]

    # Block-diagonal fused second layer padded to [2H, 2H]:
    #   mW2 in [0:H, 0:H], dW2 in [H:2H, H:H+Hd], zeros elsewhere.
    w2bd = jnp.zeros((two_h, two_h), jnp.float32)
    w2bd = w2bd.at[:H, :H].set(p["mW2"])
    w2bd = w2bd.at[H:, H:H + Hd].set(p["dW2"])

    # Bias / N=1 output slab [8, 2H] (one DMA):
    #   row 0: b1 fused (mb1 | db1)   row 1: b2 fused (mb2 | db2 | 0)
    #   row 2: mW3^T (cols 0:H)       row 3: dW3^T (cols H:H+Hd)
    #   row 4: mb3 (col 0)            row 5: db3 (col 0)      rows 6-7: pad
    slab = jnp.zeros((8, two_h), jnp.float32)
    slab = slab.at[0, :].set(jnp.concatenate([p["mb1"][0], p["db1"][0]], axis=0))
    slab = slab.at[1, :H].set(p["mb2"][0])
    slab = slab.at[1, H:H + Hd].set(p["db2"][0])
    slab = slab.at[2, :H].set(p["mW3"][:, 0])
    slab = slab.at[3, H:H + Hd].set(p["dW3"][:, 0])
    slab = slab.at[4, 0].set(p["mb3"][0, 0])
    slab = slab.at[5, 0].set(p["db3"][0, 0])

    kernel = functools.partial(
        _cssae_loss_kernel,
        reconstruction_weight=float(reconstruction_weight),
        causal_weight=float(causal_weight),
        mi_weight=float(mi_weight),
        adversarial_weight=float(adversarial_weight),
        dcor_weight=float(dcor_weight),
        bf16_matmuls=bool(bf16_matmuls),
    )

    operands = (y_stack, x_stack, w1_fused, w2bd, slab)

    # VMEM footprint estimate (operands + dcor [B,B] temps + activations),
    # capped below v7x's 64 MiB physical VMEM.
    est = 4 * (sum(op.size for op in operands)
               + 6 * batch * batch + 12 * batch * two_h)
    vmem_limit = int(min(max(2 * est, 32 << 20), 56 << 20))

    out = pl.pallas_call(
        kernel,
        out_shape=jax.ShapeDtypeStruct((1, 1), jnp.float32),
        in_specs=[pl.BlockSpec(memory_space=pltpu.MemorySpace.VMEM)
                  for _ in operands],
        # Scalar result -> SMEM: avoids the lane-sparse (1,1) VMEM vst path.
        out_specs=pl.BlockSpec(memory_space=pltpu.MemorySpace.SMEM),
        compiler_params=pltpu.CompilerParams(vmem_limit_bytes=vmem_limit),
    )(*operands)
    return out[0, 0]


if __name__ == "__main__":
    # Small, deterministic shapes.
    B, T = 8, 24               # batch, load-profile length
    BASE_DIM, WEATHER_DIM = 16, 16

    root = jax.random.PRNGKey(0)
    k_params, k_yt, k_yp, k_base, k_weather, k_perm = jax.random.split(root, 6)

    params = make_params(k_params, BASE_DIM, WEATHER_DIM)

    y_true = jax.random.normal(k_yt, (B, T), jnp.float32)
    outputs = {
        "total_reconstruction": jax.random.normal(k_yp, (B, T), jnp.float32),
        "base_embedding": jax.random.normal(k_base, (B, BASE_DIM), jnp.float32),
        "weather_embedding": jax.random.normal(k_weather, (B, WEATHER_DIM),
                                               jnp.float32),
    }

    loss = cssae_loss(y_true, outputs, params, k_perm)
    jax.block_until_ready(loss)
    assert loss.shape == () and jnp.isfinite(loss)
    print("KERNEL_OK")
</pallas_src>

<mosaic_0001>
module attributes {stable_mosaic.version = 11 : i64} {
  func.func @_cssae_loss_kernel(%arg0: memref<16x24xf32, #tpu.memory_space<vmem>>, %arg1: memref<24x16xf32, #tpu.memory_space<vmem>>, %arg2: memref<32x128xf32, #tpu.memory_space<vmem>>, %arg3: memref<128x128xf32, #tpu.memory_space<vmem>>, %arg4: memref<8x128xf32, #tpu.memory_space<vmem>>, %arg5: memref<1x1xf32, #tpu.memory_space<smem>>) attributes {dimension_semantics = [], scalar_prefetch = 0 : i64, scratch_operands = 0 : i64, tpu.core_type = #tpu.core_type<tc>} {
    %c0 = arith.constant 0 : index
    %c0_0 = arith.constant 0 : index
    %0 = vector.load %arg0[%c0, %c0_0] : memref<16x24xf32, #tpu.memory_space<vmem>>, vector<16x24xf32>
    %1 = vector.extract_strided_slice %0 {offsets = [0, 0], sizes = [8, 24], strides = [1, 1]} : vector<16x24xf32> to vector<8x24xf32>
    %2 = vector.extract_strided_slice %0 {offsets = [8, 0], sizes = [8, 24], strides = [1, 1]} : vector<16x24xf32> to vector<8x24xf32>
    %3 = arith.subf %1, %2 : vector<8x24xf32>
    %4 = arith.mulf %3, %3 : vector<8x24xf32>
    %5 = vector.shape_cast %4 : vector<8x24xf32> to vector<1x8x24xf32>
    %cst = arith.constant dense<0.000000e+00> : vector<1xf32>
    %6 = vector.multi_reduction <add>, %5, %cst [1, 2] : vector<1x8x24xf32> to vector<1xf32>
    %7 = vector.shape_cast %6 : vector<1xf32> to vector<1x1x1xf32>
    %8 = vector.extract %7[0, 0, 0] : f32 from vector<1x1x1xf32>
    %cst_1 = arith.constant 1.920000e+02 : f32
    %9 = arith.divf %8, %cst_1 : f32
    %c0_2 = arith.constant 0 : index
    %c0_3 = arith.constant 0 : index
    %10 = vector.load %arg1[%c0_2, %c0_3] : memref<24x16xf32, #tpu.memory_space<vmem>>, vector<24x16xf32>
    %11 = vector.extract_strided_slice %10 {offsets = [0, 0], sizes = [8, 16], strides = [1, 1]} : vector<24x16xf32> to vector<8x16xf32>
    %12 = vector.extract_strided_slice %10 {offsets = [8, 0], sizes = [8, 16], strides = [1, 1]} : vector<24x16xf32> to vector<8x16xf32>
    %13 = vector.extract_strided_slice %10 {offsets = [8, 0], sizes = [16, 16], strides = [1, 1]} : vector<24x16xf32> to vector<16x16xf32>
    %c0_4 = arith.constant 0 : index
    %c0_5 = arith.constant 0 : index
    %14 = vector.load %arg2[%c0_4, %c0_5] : memref<32x128xf32, #tpu.memory_space<vmem>>, vector<32x128xf32>
    %15 = vector.extract_strided_slice %14 {offsets = [0, 0], sizes = [16, 128], strides = [1, 1]} : vector<32x128xf32> to vector<16x128xf32>
    %cst_6 = arith.constant dense<0.000000e+00> : vector<8x128xf32>
    %16 = tpu.matmul %11, %15, %cst_6 {dimension_numbers = #tpu.dot_dimension_numbers<[1], [0], [0], [1], [0, 0, 1, 1], [], []>} : vector<8x16xf32>, vector<16x128xf32>, vector<8x128xf32> -> vector<8x128xf32>
    %17 = vector.extract_strided_slice %14 {offsets = [16, 0], sizes = [16, 128], strides = [1, 1]} : vector<32x128xf32> to vector<16x128xf32>
    %cst_7 = arith.constant dense<0.000000e+00> : vector<16x128xf32>
    %18 = tpu.matmul %13, %17, %cst_7 {dimension_numbers = #tpu.dot_dimension_numbers<[1], [0], [0], [1], [0, 0, 1, 1], [], []>} : vector<16x16xf32>, vector<16x128xf32>, vector<16x128xf32> -> vector<16x128xf32>
    %c0_8 = arith.constant 0 : index
    %c0_9 = arith.constant 0 : index
    %19 = vector.load %arg4[%c0_8, %c0_9] : memref<8x128xf32, #tpu.memory_space<vmem>>, vector<1x128xf32>
    %20 = vector.extract_strided_slice %18 {offsets = [0, 0], sizes = [8, 128], strides = [1, 1]} : vector<16x128xf32> to vector<8x128xf32>
    %21 = arith.addf %16, %20 : vector<8x128xf32>
    %22 = vector.broadcast %19 : vector<1x128xf32> to vector<8x128xf32>
    %23 = arith.addf %21, %22 : vector<8x128xf32>
    %cst_10 = arith.constant 0.000000e+00 : f32
    %24 = vector.broadcast %cst_10 : f32 to vector<8x128xf32>
    %25 = arith.maximumf %23, %24 : vector<8x128xf32>
    %26 = vector.extract_strided_slice %18 {offsets = [8, 0], sizes = [8, 128], strides = [1, 1]} : vector<16x128xf32> to vector<8x128xf32>
    %27 = arith.addf %16, %26 : vector<8x128xf32>
    %28 = vector.broadcast %19 : vector<1x128xf32> to vector<8x128xf32>
    %29 = arith.addf %27, %28 : vector<8x128xf32>
    %cst_11 = arith.constant 0.000000e+00 : f32
    %30 = vector.broadcast %cst_11 : f32 to vector<8x128xf32>
    %31 = arith.maximumf %29, %30 : vector<8x128xf32>
    %c0_12 = arith.constant 0 : index
    %c0_13 = arith.constant 0 : index
    %32 = vector.load %arg3[%c0_12, %c0_13] : memref<128x128xf32, #tpu.memory_space<vmem>>, vector<128x128xf32>
    %c1 = arith.constant 1 : index
    %c0_14 = arith.constant 0 : index
    %33 = vector.load %arg4[%c1, %c0_14] : memref<8x128xf32, #tpu.memory_space<vmem>>, vector<1x128xf32>
    %cst_15 = arith.constant dense<0.000000e+00> : vector<8x128xf32>
    %34 = tpu.matmul %25, %32, %cst_15 {dimension_numbers = #tpu.dot_dimension_numbers<[1], [0], [0], [1], [0, 0, 1, 1], [], []>} : vector<8x128xf32>, vector<128x128xf32>, vector<8x128xf32> -> vector<8x128xf32>
    %35 = vector.broadcast %33 : vector<1x128xf32> to vector<8x128xf32>
    %36 = arith.addf %34, %35 : vector<8x128xf32>
    %cst_16 = arith.constant 0.000000e+00 : f32
    %37 = vector.broadcast %cst_16 : f32 to vector<8x128xf32>
    %38 = arith.maximumf %36, %37 : vector<8x128xf32>
    %cst_17 = arith.constant dense<0.000000e+00> : vector<8x128xf32>
    %39 = tpu.matmul %31, %32, %cst_17 {dimension_numbers = #tpu.dot_dimension_numbers<[1], [0], [0], [1], [0, 0, 1, 1], [], []>} : vector<8x128xf32>, vector<128x128xf32>, vector<8x128xf32> -> vector<8x128xf32>
    %40 = vector.broadcast %33 : vector<1x128xf32> to vector<8x128xf32>
    %41 = arith.addf %39, %40 : vector<8x128xf32>
    %cst_18 = arith.constant 0.000000e+00 : f32
    %42 = vector.broadcast %cst_18 : f32 to vector<8x128xf32>
    %43 = arith.maximumf %41, %42 : vector<8x128xf32>
    %c2 = arith.constant 2 : index
    %c0_19 = arith.constant 0 : index
    %44 = vector.load %arg4[%c2, %c0_19] : memref<8x128xf32, #tpu.memory_space<vmem>>, vector<1x128xf32>
    %c3 = arith.constant 3 : index
    %c0_20 = arith.constant 0 : index
    %45 = vector.load %arg4[%c3, %c0_20] : memref<8x128xf32, #tpu.memory_space<vmem>>, vector<1x128xf32>
    %c4 = arith.constant 4 : index
    %c0_21 = arith.constant 0 : index
    %46 = vector.load %arg4[%c4, %c0_21] : memref<8x128xf32, #tpu.memory_space<vmem>>, vector<1x1xf32>
    %c5 = arith.constant 5 : index
    %c0_22 = arith.constant 0 : index
    %47 = vector.load %arg4[%c5, %c0_22] : memref<8x128xf32, #tpu.memory_space<vmem>>, vector<1x1xf32>
    %48 = vector.broadcast %44 : vector<1x128xf32> to vector<8x128xf32>
    %49 = arith.mulf %38, %48 : vector<8x128xf32>
    %cst_23 = arith.constant dense<0.000000e+00> : vector<8xf32>
    %50 = vector.multi_reduction <add>, %49, %cst_23 [1] : vector<8x128xf32> to vector<8xf32>
    %51 = vector.shape_cast %50 : vector<8xf32> to vector<8x1xf32>
    %52 = vector.broadcast %46 : vector<1x1xf32> to vector<8x1xf32>
    %53 = arith.addf %51, %52 : vector<8x1xf32>
    %54 = vector.broadcast %44 : vector<1x128xf32> to vector<8x128xf32>
    %55 = arith.mulf %43, %54 : vector<8x128xf32>
    %cst_24 = arith.constant dense<0.000000e+00> : vector<8xf32>
    %56 = vector.multi_reduction <add>, %55, %cst_24 [1] : vector<8x128xf32> to vector<8xf32>
    %57 = vector.shape_cast %56 : vector<8xf32> to vector<8x1xf32>
    %58 = vector.broadcast %46 : vector<1x1xf32> to vector<8x1xf32>
    %59 = arith.addf %57, %58 : vector<8x1xf32>
    %60 = vector.broadcast %45 : vector<1x128xf32> to vector<8x128xf32>
    %61 = arith.mulf %38, %60 : vector<8x128xf32>
    %cst_25 = arith.constant dense<0.000000e+00> : vector<8xf32>
    %62 = vector.multi_reduction <add>, %61, %cst_25 [1] : vector<8x128xf32> to vector<8xf32>
    %63 = vector.shape_cast %62 : vector<8xf32> to vector<8x1xf32>
    %64 = vector.broadcast %47 : vector<1x1xf32> to vector<8x1xf32>
    %65 = arith.addf %63, %64 : vector<8x1xf32>
    %66 = vector.shape_cast %59 : vector<8x1xf32> to vector<1x8x1xf32>
    %cst_26 = arith.constant dense<0xFF800000> : vector<1xf32>
    %67 = vector.multi_reduction <maximumf>, %66, %cst_26 [1, 2] : vector<1x8x1xf32> to vector<1xf32>
    %68 = vector.shape_cast %67 : vector<1xf32> to vector<1x1x1xf32>
    %69 = vector.extract %68[0, 0, 0] : f32 from vector<1x1x1xf32>
    %70 = vector.broadcast %69 : f32 to vector<8x1xf32>
    %71 = arith.subf %59, %70 : vector<8x1xf32>
    %72 = math.exp %71 : vector<8x1xf32>
    %73 = vector.shape_cast %72 : vector<8x1xf32> to vector<1x8x1xf32>
    %cst_27 = arith.constant dense<0.000000e+00> : vector<1xf32>
    %74 = vector.multi_reduction <add>, %73, %cst_27 [1, 2] : vector<1x8x1xf32> to vector<1xf32>
    %75 = vector.shape_cast %74 : vector<1xf32> to vector<1x1x1xf32>
    %76 = vector.extract %75[0, 0, 0] : f32 from vector<1x1x1xf32>
    %cst_28 = arith.constant 8.000000e+00 : f32
    %77 = arith.divf %76, %cst_28 : f32
    %78 = math.log %77 : f32
    %79 = arith.addf %69, %78 : f32
    %cst_29 = arith.constant -18.420681 : f32
    %80 = arith.maximumf %79, %cst_29 : f32
    %cst_30 = arith.constant -18.420681 : f32
    %81 = arith.minimumf %79, %cst_30 : f32
    %82 = arith.subf %81, %80 : f32
    %83 = math.exp %82 : f32
    %cst_31 = arith.constant 1.000000e+00 : f32
    %84 = arith.addf %cst_31, %83 : f32
    %85 = math.log %84 : f32
    %86 = arith.addf %80, %85 : f32
    %87 = vector.shape_cast %53 : vector<8x1xf32> to vector<1x8x1xf32>
    %cst_32 = arith.constant dense<0.000000e+00> : vector<1xf32>
    %88 = vector.multi_reduction <add>, %87, %cst_32 [1, 2] : vector<1x8x1xf32> to vector<1xf32>
    %89 = vector.shape_cast %88 : vector<1xf32> to vector<1x1x1xf32>
    %90 = vector.extract %89[0, 0, 0] : f32 from vector<1x1x1xf32>
    %cst_33 = arith.constant 8.000000e+00 : f32
    %91 = arith.divf %90, %cst_33 : f32
    %92 = arith.subf %91, %86 : f32
    %cst_34 = arith.constant 0.000000e+00 : f32
    %93 = arith.subf %cst_34, %92 : f32
    %cst_35 = arith.constant 0.000000e+00 : f32
    %94 = vector.broadcast %cst_35 : f32 to vector<8x1xf32>
    %95 = arith.maximumf %65, %94 : vector<8x1xf32>
    %96 = math.absf %65 : vector<8x1xf32>
    %cst_36 = arith.constant 0.000000e+00 : f32
    %97 = vector.broadcast %cst_36 : f32 to vector<8x1xf32>
    %98 = arith.subf %97, %96 : vector<8x1xf32>
    %99 = math.exp %98 : vector<8x1xf32>
    %cst_37 = arith.constant 1.000000e+00 : f32
    %100 = vector.broadcast %cst_37 : f32 to vector<8x1xf32>
    %101 = arith.addf %100, %99 : vector<8x1xf32>
    %102 = math.log %101 : vector<8x1xf32>
    %103 = arith.addf %95, %102 : vector<8x1xf32>
    %cst_38 = arith.constant 1.000000e+02 : f32
    %104 = vector.broadcast %cst_38 : f32 to vector<8x1xf32>
    %105 = arith.minimumf %103, %104 : vector<8x1xf32>
    %106 = vector.shape_cast %105 : vector<8x1xf32> to vector<1x8x1xf32>
    %cst_39 = arith.constant dense<0.000000e+00> : vector<1xf32>
    %107 = vector.multi_reduction <add>, %106, %cst_39 [1, 2] : vector<1x8x1xf32> to vector<1xf32>
    %108 = vector.shape_cast %107 : vector<1xf32> to vector<1x1x1xf32>
    %109 = vector.extract %108[0, 0, 0] : f32 from vector<1x1x1xf32>
    %cst_40 = arith.constant 8.000000e+00 : f32
    %110 = arith.divf %109, %cst_40 : f32
    %111 = arith.mulf %11, %11 : vector<8x16xf32>
    %cst_41 = arith.constant dense<0.000000e+00> : vector<8x8xf32>
    %112 = tpu.matmul %11, %11, %cst_41 {dimension_numbers = #tpu.dot_dimension_numbers<[1], [1], [0], [0], [0, 0, 1, 0], [], []>} : vector<8x16xf32>, vector<8x16xf32>, vector<8x8xf32> -> vector<8x8xf32>
    %cst_42 = arith.constant dense<0.000000e+00> : vector<8xf32>
    %113 = vector.multi_reduction <add>, %111, %cst_42 [1] : vector<8x16xf32> to vector<8xf32>
    %114 = vector.shape_cast %113 : vector<8xf32> to vector<8x1xf32>
    %cst_43 = arith.constant 1.000000e+00 : f32
    %115 = vector.broadcast %cst_43 : f32 to vector<8x16xf32>
    %cst_44 = arith.constant dense<0.000000e+00> : vector<8x8xf32>
    %116 = tpu.matmul %115, %111, %cst_44 {dimension_numbers = #tpu.dot_dimension_numbers<[1], [1], [0], [0], [0, 0, 1, 0], [], []>} : vector<8x16xf32>, vector<8x16xf32>, vector<8x8xf32> -> vector<8x8xf32>
    %117 = vector.broadcast %114 : vector<8x1xf32> to vector<8x8xf32>
    %118 = arith.addf %117, %116 : vector<8x8xf32>
    %cst_45 = arith.constant 2.000000e+00 : f32
    %119 = vector.broadcast %cst_45 : f32 to vector<8x8xf32>
    %120 = arith.mulf %119, %112 : vector<8x8xf32>
    %121 = arith.subf %118, %120 : vector<8x8xf32>
    %cst_46 = arith.constant 0.000000e+00 : f32
    %122 = vector.broadcast %cst_46 : f32 to vector<8x8xf32>
    %123 = arith.maximumf %121, %122 : vector<8x8xf32>
    %124 = math.sqrt %123 : vector<8x8xf32>
    %cst_47 = arith.constant dense<0.000000e+00> : vector<8xf32>
    %125 = vector.multi_reduction <add>, %124, %cst_47 [1] : vector<8x8xf32> to vector<8xf32>
    %126 = vector.shape_cast %125 : vector<8xf32> to vector<8x1xf32>
    %cst_48 = arith.constant 8.000000e+00 : f32
    %127 = vector.broadcast %cst_48 : f32 to vector<8x1xf32>
    %128 = arith.divf %126, %127 : vector<8x1xf32>
    %cst_49 = arith.constant dense<0.000000e+00> : vector<8xf32>
    %129 = vector.multi_reduction <add>, %124, %cst_49 [0] : vector<8x8xf32> to vector<8xf32>
    %130 = vector.shape_cast %129 : vector<8xf32> to vector<1x8xf32>
    %cst_50 = arith.constant 8.000000e+00 : f32
    %131 = vector.broadcast %cst_50 : f32 to vector<1x8xf32>
    %132 = arith.divf %130, %131 : vector<1x8xf32>
    %133 = vector.shape_cast %124 : vector<8x8xf32> to vector<1x8x8xf32>
    %cst_51 = arith.constant dense<0.000000e+00> : vector<1xf32>
    %134 = vector.multi_reduction <add>, %133, %cst_51 [1, 2] : vector<1x8x8xf32> to vector<1xf32>
    %135 = vector.shape_cast %134 : vector<1xf32> to vector<1x1x1xf32>
    %136 = vector.extract %135[0, 0, 0] : f32 from vector<1x1x1xf32>
    %cst_52 = arith.constant 6.400000e+01 : f32
    %137 = arith.divf %136, %cst_52 : f32
    %138 = vector.broadcast %128 : vector<8x1xf32> to vector<8x8xf32>
    %139 = arith.subf %124, %138 : vector<8x8xf32>
    %140 = vector.broadcast %132 : vector<1x8xf32> to vector<8x8xf32>
    %141 = arith.subf %139, %140 : vector<8x8xf32>
    %142 = vector.broadcast %137 : f32 to vector<8x8xf32>
    %143 = arith.addf %141, %142 : vector<8x8xf32>
    %144 = arith.mulf %12, %12 : vector<8x16xf32>
    %cst_53 = arith.constant dense<0.000000e+00> : vector<8x8xf32>
    %145 = tpu.matmul %12, %12, %cst_53 {dimension_numbers = #tpu.dot_dimension_numbers<[1], [1], [0], [0], [0, 0, 1, 0], [], []>} : vector<8x16xf32>, vector<8x16xf32>, vector<8x8xf32> -> vector<8x8xf32>
    %cst_54 = arith.constant dense<0.000000e+00> : vector<8xf32>
    %146 = vector.multi_reduction <add>, %144, %cst_54 [1] : vector<8x16xf32> to vector<8xf32>
    %147 = vector.shape_cast %146 : vector<8xf32> to vector<8x1xf32>
    %cst_55 = arith.constant 1.000000e+00 : f32
    %148 = vector.broadcast %cst_55 : f32 to vector<8x16xf32>
    %cst_56 = arith.constant dense<0.000000e+00> : vector<8x8xf32>
    %149 = tpu.matmul %148, %144, %cst_56 {dimension_numbers = #tpu.dot_dimension_numbers<[1], [1], [0], [0], [0, 0, 1, 0], [], []>} : vector<8x16xf32>, vector<8x16xf32>, vector<8x8xf32> -> vector<8x8xf32>
    %150 = vector.broadcast %147 : vector<8x1xf32> to vector<8x8xf32>
    %151 = arith.addf %150, %149 : vector<8x8xf32>
    %cst_57 = arith.constant 2.000000e+00 : f32
    %152 = vector.broadcast %cst_57 : f32 to vector<8x8xf32>
    %153 = arith.mulf %152, %145 : vector<8x8xf32>
    %154 = arith.subf %151, %153 : vector<8x8xf32>
    %cst_58 = arith.constant 0.000000e+00 : f32
    %155 = vector.broadcast %cst_58 : f32 to vector<8x8xf32>
    %156 = arith.maximumf %154, %155 : vector<8x8xf32>
    %157 = math.sqrt %156 : vector<8x8xf32>
    %cst_59 = arith.constant dense<0.000000e+00> : vector<8xf32>
    %158 = vector.multi_reduction <add>, %157, %cst_59 [1] : vector<8x8xf32> to vector<8xf32>
    %159 = vector.shape_cast %158 : vector<8xf32> to vector<8x1xf32>
    %cst_60 = arith.constant 8.000000e+00 : f32
    %160 = vector.broadcast %cst_60 : f32 to vector<8x1xf32>
    %161 = arith.divf %159, %160 : vector<8x1xf32>
    %cst_61 = arith.constant dense<0.000000e+00> : vector<8xf32>
    %162 = vector.multi_reduction <add>, %157, %cst_61 [0] : vector<8x8xf32> to vector<8xf32>
    %163 = vector.shape_cast %162 : vector<8xf32> to vector<1x8xf32>
    %cst_62 = arith.constant 8.000000e+00 : f32
    %164 = vector.broadcast %cst_62 : f32 to vector<1x8xf32>
    %165 = arith.divf %163, %164 : vector<1x8xf32>
    %166 = vector.shape_cast %157 : vector<8x8xf32> to vector<1x8x8xf32>
    %cst_63 = arith.constant dense<0.000000e+00> : vector<1xf32>
    %167 = vector.multi_reduction <add>, %166, %cst_63 [1, 2] : vector<1x8x8xf32> to vector<1xf32>
    %168 = vector.shape_cast %167 : vector<1xf32> to vector<1x1x1xf32>
    %169 = vector.extract %168[0, 0, 0] : f32 from vector<1x1x1xf32>
    %cst_64 = arith.constant 6.400000e+01 : f32
    %170 = arith.divf %169, %cst_64 : f32
    %171 = vector.broadcast %161 : vector<8x1xf32> to vector<8x8xf32>
    %172 = arith.subf %157, %171 : vector<8x8xf32>
    %173 = vector.broadcast %165 : vector<1x8xf32> to vector<8x8xf32>
    %174 = arith.subf %172, %173 : vector<8x8xf32>
    %175 = vector.broadcast %170 : f32 to vector<8x8xf32>
    %176 = arith.addf %174, %175 : vector<8x8xf32>
    %177 = arith.mulf %143, %176 : vector<8x8xf32>
    %178 = vector.shape_cast %177 : vector<8x8xf32> to vector<1x8x8xf32>
    %cst_65 = arith.constant dense<0.000000e+00> : vector<1xf32>
    %179 = vector.multi_reduction <add>, %178, %cst_65 [1, 2] : vector<1x8x8xf32> to vector<1xf32>
    %180 = vector.shape_cast %179 : vector<1xf32> to vector<1x1x1xf32>
    %181 = vector.extract %180[0, 0, 0] : f32 from vector<1x1x1xf32>
    %cst_66 = arith.constant 6.400000e+01 : f32
    %182 = arith.divf %181, %cst_66 : f32
    %cst_67 = arith.constant 0.000000e+00 : f32
    %183 = arith.maximumf %182, %cst_67 : f32
    %184 = math.sqrt %183 : f32
    %185 = arith.mulf %143, %143 : vector<8x8xf32>
    %186 = vector.shape_cast %185 : vector<8x8xf32> to vector<1x8x8xf32>
    %cst_68 = arith.constant dense<0.000000e+00> : vector<1xf32>
    %187 = vector.multi_reduction <add>, %186, %cst_68 [1, 2] : vector<1x8x8xf32> to vector<1xf32>
    %188 = vector.shape_cast %187 : vector<1xf32> to vector<1x1x1xf32>
    %189 = vector.extract %188[0, 0, 0] : f32 from vector<1x1x1xf32>
    %cst_69 = arith.constant 6.400000e+01 : f32
    %190 = arith.divf %189, %cst_69 : f32
    %cst_70 = arith.constant 0.000000e+00 : f32
    %191 = arith.maximumf %190, %cst_70 : f32
    %192 = math.sqrt %191 : f32
    %193 = arith.mulf %176, %176 : vector<8x8xf32>
    %194 = vector.shape_cast %193 : vector<8x8xf32> to vector<1x8x8xf32>
    %cst_71 = arith.constant dense<0.000000e+00> : vector<1xf32>
    %195 = vector.multi_reduction <add>, %194, %cst_71 [1, 2] : vector<1x8x8xf32> to vector<1xf32>
    %196 = vector.shape_cast %195 : vector<1xf32> to vector<1x1x1xf32>
    %197 = vector.extract %196[0, 0, 0] : f32 from vector<1x1x1xf32>
    %cst_72 = arith.constant 6.400000e+01 : f32
    %198 = arith.divf %197, %cst_72 : f32
    %cst_73 = arith.constant 0.000000e+00 : f32
    %199 = arith.maximumf %198, %cst_73 : f32
    %200 = math.sqrt %199 : f32
    %201 = arith.mulf %192, %200 : f32
    %202 = math.sqrt %201 : f32
    %cst_74 = arith.constant 9.99999993E-9 : f32
    %203 = arith.addf %202, %cst_74 : f32
    %204 = arith.divf %184, %203 : f32
    %cst_75 = arith.constant 1.000000e+00 : f32
    %205 = arith.mulf %cst_75, %93 : f32
    %cst_76 = arith.constant 5.000000e-01 : f32
    %206 = arith.mulf %cst_76, %110 : f32
    %207 = arith.addf %205, %206 : f32
    %cst_77 = arith.constant 3.000000e-01 : f32
    %208 = arith.mulf %cst_77, %204 : f32
    %209 = arith.addf %207, %208 : f32
    %cst_78 = arith.constant 1.000000e+00 : f32
    %210 = arith.mulf %cst_78, %9 : f32
    %cst_79 = arith.constant 1.000000e-01 : f32
    %211 = arith.mulf %cst_79, %209 : f32
    %212 = arith.addf %210, %211 : f32
    %c0_80 = arith.constant 0 : index
    %c0_81 = arith.constant 0 : index
    %213 = memref.load %arg5[%c0_80, %c0_81] : memref<1x1xf32, #tpu.memory_space<smem>>
    memref.store %212, %arg5[%c0_80, %c0_81] : memref<1x1xf32, #tpu.memory_space<smem>>
    return
  }
}

</mosaic_0001>

<bundles_post_ra>
// kernel: tpu_custom_call.1
= control target key start
LH: loop header
LB: loop body
LE: loop exit
PB: predicated region body
PF: predicated region fallthrough
CT: control target
= control target key end

     0   :  { %10 = vsyncpa [#allocation3], 0  ;;  %s1589_s0 = inlined_call_operand.hbm [shape: f32[16,24], index: 0, kind: input, shape index: {}]   ;;  %s1590_s1 = inlined_call_operand.vmem [shape: f32[24,16], index: 1, kind: input, shape index: {}]   ;;  %s1591_s2 = inlined_call_operand.vmem [shape: f32[32,128], index: 2, kind: input, shape index: {}]   ;;  %s1592_s3 = inlined_call_operand.hbm [shape: f32[128,128], index: 3, kind: input, shape index: {}]   ;;  %s1593_s4 = inlined_call_operand.vmem [shape: f32[8,128], index: 4, kind: input, shape index: {}]   ;;  %s1594_s5 = inlined_call_operand.hbm [shape: f32[1,1], index: 5, kind: output, shape index: {}]  }
   0x1   :  { %11 = vsyncpa [#allocation6], 0 }
   0x2   :  { %12 = vsyncpa [#allocation4], 0  ;;  %s1358_s18 = smov [#allocation2]   ;;  %s1298_s22 = scalar_lea.hbm %s1589_s0, 256 }
   0x3   :  { %s18_s19 = sshll.u32 %s1358_s18, 4  ;;  %p1299_p0 = scmp.ne.s32.totalorder %s1589_s0, %s1298_s22  ;;  %s19_s19 = int_to_ptr.vmem [resolvable:$true] %s18_s19 }
   0x4   :  { %p1302_p1 = scmp.lt.u32.totalorder %s1298_s22, %s1589_s0 }
   0x6   :  { %p1304_p2 = pnand %p1302_p1, %p1299_p0 }
   0x8   :  { %1307 = shalt.err (!%p1304_p2)
}
   0x9   :  { %s1308_s27 = scalar_lea.vmem %s19_s19, 256  ;;  %p1313_p4 = scmp.lt.s32.totalorder %s19_s19, %s19_s19 }
   0xa   :  { %p1309_p3 = scmp.ne.s32.totalorder %s19_s19, %s1308_s27  ;;  %p1314_p5 = scmp.lt.s32.totalorder %s1308_s27, %s1308_s27 }
   0xc   :  { %p1315_p6 = por %p1314_p5, %p1313_p4 }
   0xe   :  { %p1316_p7 = pnand %p1315_p6, %p1309_p3 }
  0x10   :  { %1319 = shalt.err (!%p1316_p7)
}
  0x11   :  { %s1359_s28 = smov 128   ;;  %s1360_s29 = smov 8  }
  0x12   :  { %24 = dma.hbm_to_vmem [thread:$0]  %s1589_s0, 256, %s19_s19, [#allocation3], %s1359_s28, %s1359_s28, %s1360_s29  }
  0x13   :  { %s1361_s7 = smov [#allocation5]   ;;  %s1320_s11 = scalar_lea.hbm %s1592_s3, 2048 }
  0x14   :  { %s34_s8 = sshll.u32 %s1361_s7, 4  ;;  %p1321_p8 = scmp.ne.s32.totalorder %s1592_s3, %s1320_s11  ;;  %s35_s8 = int_to_ptr.vmem [resolvable:$true] %s34_s8 }
  0x15   :  { %p1324_p9 = scmp.lt.u32.totalorder %s1320_s11, %s1592_s3 }
  0x17   :  { %p1326_p10 = pnand %p1324_p9, %p1321_p8 }
  0x19   :  { %1329 = shalt.err (!%p1326_p10)
}
  0x1a   :  { %s1330_s16 = scalar_lea.vmem %s35_s8, 2048  ;;  %p1335_p12 = scmp.lt.s32.totalorder %s35_s8, %s35_s8 }
  0x1b   :  { %p1331_p11 = scmp.ne.s32.totalorder %s35_s8, %s1330_s16  ;;  %p1336_p13 = scmp.lt.s32.totalorder %s1330_s16, %s1330_s16 }
  0x1d   :  { %p1337_p0 = por %p1336_p13, %p1335_p12 }
  0x1f   :  { %p1338_p1 = pnand %p1337_p0, %p1331_p11 }
  0x21   :  { %1341 = shalt.err (!%p1338_p1)
}
  0x22   :  { %40 = dma.hbm_to_vmem [thread:$0]  %s1592_s3, 2048, %s35_s8, [#allocation6], %s1359_s28, %s1359_s28, %s1360_s29  }
  0x23   :  { %1352 = dma.done.wait [#allocation3], 256  }
  0x24   :  { %1353 = vsyncadd [#allocation3], 4294967040 }
  0x25   :  { %1354 = dma.done.wait [#allocation6], 2048  }
  0x26   :  { %1355 = vsyncadd [#allocation6], 4294965248  ;;  %v1362_v0 = vmov 0.0|0.0   ;;  %vm1363_vm0 = vmmov 0   ;;  %v1364_v1 = vmov 0.0   ;;  %vm74_vm1 = vcmask 130048  }
  0x27   :  { %1170 = vmatprep.subr.bf16.mxu0 %v1362_v0  ;;  %1070 = vmatprep.mubr.msk.f32.mxu0 %vm1363_vm0, %v1364_v1  ;;  %v70_v2 = vld [vmem:[%s1591_s2] sm:$0xff]  ;;  %v71_v3 = vld [vmem:[%s1591_s2 + $0x8] sm:$0xff]  ;;  %v72_v4 = vld [vmem:[%s1591_s2 + $0x10] sm:$0xff]  ;;  %vm53_vm2 = vcmask 195584   ;;  %vm435_vm3 = vcmask 7168   ;;  %vm680_vm6 = vcmask 64512  }
  0x28   :  { %v1171_v5 = vpack.c.bf16 %v71_v3, %v70_v2  ;;  %v73_v6 = vld [vmem:[%s1591_s2 + $0x18] sm:$0xff]  ;;  %v1441_v7 = vld [vmem:[%s1590_s1 + $0x8] sm:$0xff]  ;;  %v240_v9 = vld [vmem:[#allocation5] sm:$0xff]  ;;  %s1366_s20 = smov -18.420681   ;;  %s1367_s14 = smov 0.0  }
  0x29   :  { %v1173_v8 = vpack.c.bf16 %v73_v6, %v72_v4  ;;  %1077 = vmatprep.mubr.msk.f32.mxu1 %vm74_vm1, %v1441_v7  ;;  %v241_v10 = vld [vmem:[#allocation5 + $0x8] sm:$0xff]  ;;  %v1448_v11 = vld [vmem:[%s1590_s1] sm:$0xff]  ;;  %v243_v14 = vld [vmem:[#allocation5 + $0x18] sm:$0xff]  ;;  %v707_v3 = vmul.f32 %v1441_v7, %v1441_v7  ;;  %v1365_v4 = vmov 1.0  }
  0x2a   :  { %1172 = vmatpush3.bf16.msra.mxu0 %v1171_v5  ;;  %v1178_v12 = vpack.c.bf16 %v241_v10, %v240_v9  ;;  %v242_v13 = vld [vmem:[#allocation5 + $0x10] sm:$0xff]  ;;  %v69_v15 = vld [vmem:[%s1590_s1 + $0x10] sm:$0xff]  ;;  %v245_v18 = vld [vmem:[#allocation5 + $0x28] sm:$0xff]  ;;  %v1483_v43 = vmul.f32 %v1448_v11, %v1448_v11 }
  0x2b   :  { %1174 = vmatprep.subr.bf16.mxu1 %v1173_v8  ;;  %1177 = vmatprep.subr.bf16.mxu0 %v1362_v0  ;;  %v1181_v16 = vpack.c.bf16 %v243_v14, %v242_v13  ;;  %v244_v17 = vld [vmem:[#allocation5 + $0x20] sm:$0xff]  ;;  %v246_v20 = vld [vmem:[#allocation5 + $0x30] sm:$0xff]  ;;  %v247_v21 = vld [vmem:[#allocation5 + $0x38] sm:$0xff]  ;;  %v778_v5 = vsel %vm74_vm1, %v707_v3, 0.0 }
  0x2c   :  { %1176 = vmatpush3.bf16.msra.mxu1 %v1173_v8  ;;  %v1184_v19 = vpack.c.bf16 %v245_v18, %v244_v17  ;;  %v1187_v22 = vpack.c.bf16 %v247_v21, %v246_v20  ;;  %v248_v23 = vld [vmem:[#allocation5 + $0x40] sm:$0xff]  ;;  %v249_v24 = vld [vmem:[#allocation5 + $0x48] sm:$0xff]  ;;  %v250_v26 = vld [vmem:[#allocation5 + $0x50] sm:$0xff] }
  0x2d   :  { %1071 = vmatmul.mubr.msk.f32.vlgmr.msra.gmra.mrb[0].mxu0 %vm74_vm1, %v1448_v11  ;;  %1201 = vmatprep.subr.bf16.mxu1 %v1362_v0  ;;  %v1190_v25 = vpack.c.bf16 %v249_v24, %v248_v23  ;;  %v251_v27 = vld [vmem:[#allocation5 + $0x58] sm:$0xff]  ;;  %v252_v29 = vld [vmem:[#allocation5 + $0x60] sm:$0xff]  ;;  %v253_v30 = vld [vmem:[#allocation5 + $0x68] sm:$0xff] }
  0x2e   :  { %1179 = vmatpush3.bf16.msra.mxu0 %v1178_v12  ;;  %1112 = vmatprep.mubr.msk.f32.mxu0 %vm1363_vm0, %v1364_v1  ;;  %v1193_v28 = vpack.c.bf16 %v251_v27, %v250_v26  ;;  %v1196_v31 = vpack.c.bf16 %v253_v30, %v252_v29  ;;  %v254_v32 = vld [vmem:[#allocation5 + $0x70] sm:$0xff]  ;;  %v255_v33 = vld [vmem:[#allocation5 + $0x78] sm:$0xff] }
  0x2f   :  { %1078 = vmatmul.mubr.msk.f32.vlgmr.msra.gmra.mrb[0].mxu1 %vm74_vm1, %v69_v15  ;;  %1180 = vmatprep.subr.bf16.mxu0 %v1362_v0  ;;  %v1199_v34 = vpack.c.bf16 %v255_v33, %v254_v32  ;;  %v1003_v38 = vld [vmem:[%s1593_s4] ss:$0 sm:$0xff]  ;;  %v50_v48 = vld [vmem:[#allocation2 + $0x8] sm:$0xff]  ;;  %v1004_v49 = vld [vmem:[%s1593_s4 + $0x1] ss:$0 sm:$0xff] }
  0x30   :  { %1203 = vmatpush3.bf16.msra.mxu1 %v1178_v12  ;;  %1147 = vmatprep.mubr.msk.f32.mxu1 %vm1363_vm0, %v1364_v1  ;;  %v49_v47 = vld [vmem:[#allocation2] sm:$0xff] }
  0x31   :  { %1204 = vmatprep.subr.bf16.mxu1 %v1362_v0  ;;  %v51_v51 = vsub.f32 %v49_v47, %v50_v48  ;;  %v1005_v57 = vld [vmem:[%s1593_s4 + $0x2] ss:$0 sm:$0xff]  ;;  %v1525_v6 = vld [vmem:[%s1593_s4 + $0x4] ss:$0 sm:$0xff] }
  0x32   :  { %1182 = vmatpush3.bf16.msra.mxu0 %v1181_v16 }
  0x33   :  { %1183 = vmatprep.subr.bf16.mxu0 %v1362_v0  ;;  %v52_v60 = vmul.f32 %v51_v51, %v51_v51 }
  0x34   :  { %1206 = vmatpush3.bf16.msra.mxu1 %v1181_v16 }
  0x35   :  { %1207 = vmatprep.subr.bf16.mxu1 %v1362_v0  ;;  %v54_v63 = vsel %vm53_vm2, %v52_v60, 0.0 }
  0x36   :  { %1185 = vmatpush3.bf16.msra.mxu0 %v1184_v19 }
  0x37   :  { %1186 = vmatprep.subr.bf16.mxu0 %v1362_v0 }
  0x38   :  { %1209 = vmatpush3.bf16.msra.mxu1 %v1184_v19 }
  0x39   :  { %1210 = vmatprep.subr.bf16.mxu1 %v1362_v0 }
  0x3a   :  { %1188 = vmatpush3.bf16.msra.mxu0 %v1187_v22 }
  0x3b   :  { %1189 = vmatprep.subr.bf16.mxu0 %v1362_v0 }
  0x3c   :  { %1212 = vmatpush3.bf16.msra.mxu1 %v1187_v22 }
  0x3d   :  { %1213 = vmatprep.subr.bf16.mxu1 %v1362_v0 }
  0x3e   :  { %1191 = vmatpush3.bf16.msra.mxu0 %v1190_v25 }
  0x3f   :  { %1192 = vmatprep.subr.bf16.mxu0 %v1362_v0 }
  0x40   :  { %1215 = vmatpush3.bf16.msra.mxu1 %v1190_v25 }
  0x41   :  { %1216 = vmatprep.subr.bf16.mxu1 %v1362_v0 }
  0x42   :  { %1194 = vmatpush3.bf16.msra.mxu0 %v1193_v28 }
  0x43   :  { %1195 = vmatprep.subr.bf16.mxu0 %v1362_v0 }
  0x44   :  { %1218 = vmatpush3.bf16.msra.mxu1 %v1193_v28 }
  0x45   :  { %1219 = vmatprep.subr.bf16.mxu1 %v1362_v0 }
  0x46   :  { %1197 = vmatpush3.bf16.msra.mxu0 %v1196_v31 }
  0x47   :  { %1198 = vmatprep.subr.bf16.mxu0 %v1362_v0 }
  0x48   :  { %1221 = vmatpush3.bf16.msra.mxu1 %v1196_v31 }
  0x49   :  { %1222 = vmatprep.subr.bf16.mxu1 %v1362_v0  ;;  %v1007_v0 = vld [vmem:[%s1593_s4 + $0x3] ss:$0 sm:$0xff] }
  0x4a   :  { %1200 = vmatpush3.bf16.msra.mxu0 %v1199_v34 }
  0x4b   :  { %1150 = vmatprep.subr.mxu0 %v1364_v1 }
  0x4c   :  { %1224 = vmatpush3.bf16.msra.mxu1 %v1199_v34 }
  0x4d   :  { %1155 = vmatprep.subr.mxu1 %v1364_v1 }
 0x100   :  { %v144_v35 = vpop.f32.mrb[0].mxu0 }
 0x101   :  { %v1072_v36 = vpop.f32.mrb[1].mxu0 }
 0x102   :  { %v1079_v37 = vpop.f32.mrb[0].mxu1  ;;  %v1008_v36 = vld [vmem:[%s1593_s4 + $0x5] ss:$0 sm:$0xff] }
 0x103   :  { %v237_v39 = vadd.f32 %v1079_v37, %v144_v35  ;;  %v220_v40 = vpop.f32.mrb[1].mxu1 }
 0x104   :  { %v230_v41 = vadd.f32 %v220_v40, %v144_v35 }
 0x105   :  { %v238_v42 = vadd.f32 %v1003_v38, %v237_v39 }
 0x106   :  { %v235_v44 = vadd.f32 %v1003_v38, %v230_v41 }
 0x107   :  { %v239_v45 = vmax.f32 %v238_v42, 0.0 }
 0x108   :  { %v236_v46 = vmax.f32 %v235_v44, 0.0 }
 0x109   :  { %1148 = vmatmul.mubr.f32.vlgmr.msra.gmra.mrb[2].mxu1 %v239_v45 }
 0x10a   :  { %1113 = vmatmul.mubr.f32.vlgmr.msra.gmra.mrb[2].mxu0 %v236_v46  ;;  %1156 = vmatpush3.xpose.msk.msra.mxu1 %vm74_vm1, %v1483_v43 }
 0x10b   :  { %1151 = vmatpush3.xpose.msk.msra.mxu0 %vm74_vm1, %v1448_v11  ;;  %1152 = vmatprep.mubr.msk.f32.mxu0 %vm1363_vm0, %v1364_v1 }
 0x10c   :  { %1157 = vmatprep.mubr.msk.f32.mxu1 %vm1363_vm0, %v1364_v1  ;;  %1160 = vmatprep.subr.mxu0 %v1364_v1 }
 0x10d   :  { %1165 = vmatprep.subr.mxu1 %v1364_v1  ;;  %1158 = vmatmul.mubr.msk.f32.vlgmr.msra.gmra.mrb[4].mxu1 %vm74_vm1, %v1365_v4 }
 0x10e   :  { %1153 = vmatmul.mubr.msk.f32.vlgmr.msra.gmra.mrb[4].mxu0 %vm74_vm1, %v1448_v11  ;;  %1166 = vmatpush3.xpose.msk.msra.mxu1 %vm74_vm1, %v707_v3 }
 0x10f   :  { %1161 = vmatpush3.xpose.msk.msra.mxu0 %vm74_vm1, %v1441_v7  ;;  %1162 = vmatprep.mubr.msk.f32.mxu0 %vm1363_vm0, %v1364_v1 }
 0x110   :  { %1167 = vmatprep.mubr.msk.f32.mxu1 %vm1363_vm0, %v1364_v1 }
 0x111   :  { %1168 = vmatmul.mubr.msk.f32.vlgmr.msra.gmra.mrb[6].mxu1 %vm74_vm1, %v1365_v4 }
 0x112   :  { %1163 = vmatmul.mubr.msk.f32.vlgmr.msra.gmra.mrb[6].mxu0 %vm74_vm1, %v1441_v7 }
 0x1dc   :  { %v398_v50 = vpop.f32.mrb[2].mxu1 }
 0x1dd   :  { %v399_v52 = vadd.f32 %v1004_v49, %v398_v50  ;;  %v327_v53 = vpop.f32.mrb[2].mxu0  ;;  %v1149_v54 = vpop.f32.mrb[3].mxu1 }
 0x1de   :  { %v328_v55 = vadd.f32 %v1004_v49, %v327_v53  ;;  %v1114_v56 = vpop.f32.mrb[3].mxu0  ;;  %v590_v54 = vsel %vm74_vm1, %v1483_v43, 0.0 }
 0x1df   :  { %v402_v58 = vmax.f32 %v399_v52, 0.0 }
 0x1e0   :  { %v331_v59 = vmax.f32 %v328_v55, 0.0  ;;  %v665_v21 = vpop.f32.mrb[4].mxu1 }
 0x1e1   :  { %v419_v61 = vmul.f32 %v1005_v57, %v402_v58  ;;  %v586_v16 = vpop.f32.mrb[4].mxu0  ;;  %v1159_v22 = vpop.f32.mrb[5].mxu1 }
 0x1e2   :  { %v1509_v62 = vmul.f32 %v1005_v57, %v331_v59  ;;  %v427_v2 = vmul.f32 %v1007_v0, %v331_v59  ;;  %v1154_v17 = vpop.f32.mrb[5].mxu0 }
 0x1e3   :  { %420 = vadd.xlane.f32.xlu0 %v419_v61 }
 0x1e4   :  { %v850_v25 = vpop.f32.mrb[6].mxu1 }
 0x1e5   :  { %v774_v19 = vpop.f32.mrb[6].mxu0  ;;  %v1169_v27 = vpop.f32.mrb[7].mxu1 }
 0x1e6   :  { %v1164_v20 = vpop.f32.mrb[7].mxu0  ;;  %v855_v24 = vmul.f32 2.0, %v774_v19 }
 0x1e7   :  { %55 = vadd.xlane.f32.xlu0 %v54_v63 }
 0x1eb   :  { %428 = vadd.xlane.f32.xlu0 %v427_v2  ;;  %v670_v2 = vmul.f32 2.0, %v586_v16 }
 0x1ef   :  { %779 = vadd.xlane.f32.xlu0 %v778_v5 }
 0x270   :  { %v421_v8 = vpop.xlane.xlu0 %420 }
 0x271   :  { %v422_v7 = vadd.f32 %v1525_v6, %v421_v8 }
 0x273   :  { %v436_v9 = vsel %vm435_vm3, %v422_v7, -inf }
 0x274   :  { %437 = vmax.xlane.f32.xlu1 %v436_v9  ;;  %v56_v10 = vpop.xlane.xlu0 %55 }
 0x275   :  { %v57_v11 = vrot.slane %v56_v10, 4 }
 0x277   :  { %v58_v12 = vadd.f32 %v57_v11, %v56_v10 }
 0x278   :  { %v429_v18 = vpop.xlane.xlu0 %428 }
 0x279   :  { %v59_v13 = vrot.slane %v58_v12, 2  ;;  %v434_v37 = vadd.f32 %v1008_v36, %v429_v18 }
 0x27b   :  { %v60_v1 = vadd.f32 %v59_v13, %v58_v12  ;;  %v497_v38 = vand.u32 2147483647, %v434_v37  ;;  %v496_v53 = vmax.f32 %v434_v37, 0.0 }
 0x27c   :  { %v780_v23 = vpop.xlane.xlu0 %779 }
 0x27d   :  { %v61_v14 = vrot.slane %v60_v1, 1  ;;  %v854_v26 = vadd.f32 %v850_v25, %v780_v23  ;;  %v498_v39 = vsub.f32 0.0, %v497_v38 }
 0x27f   :  { %v62_v15 = vadd.f32 %v61_v14, %v60_v1  ;;  %v856_v28 = vsub.f32 %v854_v26, %v855_v24  ;;  %v499_v40 = vmul.f32 1.442695, %v498_v39 }
 0x281   :  { %1225 = vpush %v62_v15  ;;  %1272 = vpow2.f32 %v499_v40  ;;  %v857_v47 = vmax.f32 %v856_v28, 0.0 }
 0x283   :  { %vm860_vm4 = vcmp.eq.f32.partialorder %v857_v47, inf  ;;  %v863_v57 = vand.u32 2147483648, %v857_v47  ;;  %vm862_vm5 = vcmp.eq.f32.partialorder %v857_v47, 0.0 }
 0x28b   :  { %v1273_v41 = vpop.eup %1272 }
 0x28c   :  { %v501_v42 = vadd.f32 1.0, %v1273_v41 }
 0x28e   :  { %1274 = vlog2.f32 %v501_v42 }
 0x298   :  { %v1275_v48 = vpop.eup %1274 }
 0x299   :  { %v503_v51 = vmul.f32 0.6931472, %v1275_v48 }
 0x29b   :  { %v504_v55 = vadd.f32 %v503_v51, %v496_v53 }
 0x29d   :  { %v505_v58 = vmin.f32 %v504_v55, 100.0 }
 0x29f   :  { %v506_v61 = vsel %vm435_vm3, %v505_v58, 0.0 }
 0x2b2   :  { %s1532_s16 = spop %1225 }
 0x301   :  { %v438_v29 = vpop.xlane.xlu1 %437 }
 0x302   :  { %v439_v30 = vrot.slane %v438_v29, 4 }
 0x304   :  { %v440_v31 = vmax.f32 %v438_v29, %v439_v30 }
 0x306   :  { %v441_v32 = vrot.slane %v440_v31, 2 }
 0x308   :  { %v442_v33 = vmax.f32 %v440_v31, %v441_v32 }
 0x30a   :  { %v443_v34 = vrot.slane %v442_v33, 1 }
 0x30c   :  { %v444_v35 = vmax.f32 %v442_v33, %v443_v34 }
 0x30e   :  { %1227 = vpush %v444_v35 }
 0x33f   :  { %s1534_s0 = spop %1227 }
 0x340   :  { %v446_v44 = vstv %s1534_s0 }
 0x341   :  { %v447_v45 = vsub.f32 %v422_v7, %v446_v44 }
 0x343   :  { %v448_v46 = vmul.f32 1.442695, %v447_v45 }
 0x345   :  { %1276 = vpow2.f32 %v448_v46 }
 0x346   :  { %1278 = vrsqrt.f32 %v857_v47 }
 0x34f   :  { %v1277_v49 = vpop.eup %1276 }
 0x350   :  { %v450_v50 = vsel %vm435_vm3, %v1277_v49, 0.0  ;;  %v1279_v52 = vpop.eup %1278 }
 0x351   :  { %451 = vadd.xlane.f32.xlu1 %v450_v50  ;;  %v859_v56 = vmul.f32 %v1279_v52, %v857_v47 }
 0x353   :  { %v861_v59 = vsel %vm860_vm4, %v857_v47, %v859_v56 }
 0x354   :  { %v1541_v60 = vsel %vm862_vm5, %v863_v57, %v861_v59 }
 0x355   :  { %591 = vadd.xlane.f32.xlu1 %v590_v54  ;;  %v1546_v63 = vsel %vm680_vm6, %v1541_v60, 0.0 }
 0x356   :  { %v869_v57 = vrot.slane %v1546_v63, 4 }
 0x358   :  { %v870_v59 = vadd.f32 %v869_v57, %v1546_v63 }
 0x359   :  { %412 = vadd.xlane.f32.xlu1 %v1509_v62 }
 0x35d   :  { %507 = vadd.xlane.f32.xlu1 %v506_v61 }
 0x361   :  { %866 = vadd.xlane.f32.xlu1 %v1546_v63 }
 0x3de   :  { %v452_v43 = vpop.xlane.xlu1 %451 }
 0x3df   :  { %v453_v0 = vrot.slane %v452_v43, 4 }
 0x3e1   :  { %v454_v3 = vadd.f32 %v453_v0, %v452_v43  ;;  %v871_v43 = vrot.slane %v870_v59, 2 }
 0x3e2   :  { %v592_v4 = vpop.xlane.xlu1 %591 }
 0x3e3   :  { %v455_v5 = vrot.slane %v454_v3, 2  ;;  %v669_v8 = vadd.f32 %v665_v21, %v592_v4 }
 0x3e5   :  { %v671_v62 = vsub.f32 %v669_v8, %v670_v2  ;;  %v456_v7 = vadd.f32 %v455_v5, %v454_v3  ;;  %v872_v2 = vadd.f32 %v871_v43, %v870_v59 }
 0x3e6   :  { %v413_v9 = vpop.xlane.xlu1 %412 }
 0x3e7   :  { %v672_v10 = vmax.f32 %v671_v62, 0.0  ;;  %v418_v11 = vadd.f32 %v1525_v6, %v413_v9  ;;  %v457_v12 = vrot.slane %v456_v7, 1  ;;  %v873_v4 = vrot.slane %v872_v2, 1 }
 0x3e9   :  { %v481_v13 = vsel %vm435_vm3, %v418_v11, 0.0  ;;  %v458_v1 = vadd.f32 %v457_v12, %v456_v7  ;;  %1280 = vrsqrt.f32 %v672_v10  ;;  %vm675_vm7 = vcmp.eq.f32.partialorder %v672_v10, inf }
 0x3ea   :  { %482 = vadd.xlane.f32.xlu0 %v481_v13  ;;  %v678_v15 = vand.u32 2147483648, %v672_v10  ;;  %vm677_vm8 = vcmp.eq.f32.partialorder %v672_v10, 0.0  ;;  %v508_v26 = vpop.xlane.xlu1 %507  ;;  %v874_v9 = vadd.f32 %v873_v4, %v872_v2 }
 0x3eb   :  { %1229 = vpush %v458_v1  ;;  %v509_v28 = vrot.slane %v508_v26, 4 }
 0x3ec   :  { %v875_v12 = vmul.f32 0.125, %v874_v9 }
 0x3ed   :  { %v510_v34 = vadd.f32 %v509_v28, %v508_v26 }
 0x3ee   :  { %v867_v30 = vpop.xlane.xlu1 %866 }
 0x3ef   :  { %v876_v32 = vrot.slane %v867_v30, 4  ;;  %v511_v39 = vrot.slane %v510_v34, 2  ;;  %v868_v62 = vmul.f32 0.125, %v867_v30 }
 0x3f1   :  { %v877_v36 = vadd.f32 %v876_v32, %v867_v30  ;;  %v512_v44 = vadd.f32 %v511_v39, %v510_v34  ;;  %v886_v63 = vsub.f32 %v1541_v60, %v868_v62 }
 0x3f3   :  { %v1281_v14 = vpop.eup %1280  ;;  %v878_v41 = vrot.slane %v877_v36, 2  ;;  %v513_v48 = vrot.slane %v512_v44, 1 }
 0x3f4   :  { %v674_v16 = vmul.f32 %v1281_v14, %v672_v10 }
 0x3f5   :  { %v879_v46 = vadd.f32 %v878_v41, %v877_v36  ;;  %v514_v54 = vadd.f32 %v513_v48, %v512_v44 }
 0x3f6   :  { %v676_v17 = vsel %vm675_vm7, %v672_v10, %v674_v16 }
 0x3f7   :  { %v1551_v18 = vsel %vm677_vm8, %v678_v15, %v676_v17  ;;  %v880_v52 = vrot.slane %v879_v46, 1  ;;  %v887_v15 = vsub.f32 %v886_v63, %v875_v12 }
 0x3f8   :  { %v681_v19 = vsel %vm680_vm6, %v1551_v18, 0.0 }
 0x3f9   :  { %682 = vadd.xlane.f32.xlu0 %v681_v19  ;;  %v881_v56 = vadd.f32 %v880_v52, %v879_v46  ;;  %v686_v58 = vrot.slane %v681_v19, 4 }
 0x3fb   :  { %v687_v61 = vadd.f32 %v686_v58, %v681_v19 }
 0x3fd   :  { %v688_v0 = vrot.slane %v687_v61, 2 }
 0x3ff   :  { %v689_v3 = vadd.f32 %v688_v0, %v687_v61 }
 0x401   :  { %v690_v5 = vrot.slane %v689_v3, 1 }
 0x403   :  { %v691_v7 = vadd.f32 %v690_v5, %v689_v3 }
 0x405   :  { %v692_v11 = vmul.f32 0.125, %v691_v7 }
 0x41c   :  { %s1230_s4 = spop %1229 }
 0x41d   :  { %s462_s17 = smul.f32 0.125, %s1230_s4 }
 0x41f   :  { %v463_v6 = vstv %s462_s17 }
 0x420   :  { %1282 = vlog2.f32 %v463_v6 }
 0x42a   :  { %v1283_v20 = vpop.eup %1282 }
 0x42b   :  { %v465_v21 = vmul.f32 0.6931472, %v1283_v20 }
 0x42d   :  { %1231 = vpush %v465_v21 }
 0x45e   :  { %s1232_s18 = spop %1231 }
 0x45f   :  { %s467_s19 = sadd.f32 %s1232_s18, %s1534_s0 }
 0x461   :  { %s1556_s21 = smax.f32 %s1366_s20, %s467_s19  ;;  %s469_s3 = smin.f32 %s1366_s20, %s467_s19 }
 0x462   :  { %s470_s22 = ssub.f32 %s469_s3, %s1556_s21 }
 0x464   :  { %v471_v22 = vstv %s470_s22 }
 0x465   :  { %v472_v23 = vmul.f32 1.442695, %v471_v22 }
 0x467   :  { %1284 = vpow2.f32 %v472_v23 }
 0x471   :  { %v1285_v24 = vpop.eup %1284 }
 0x472   :  { %1233 = vpush %v1285_v24 }
 0x477   :  { %v483_v25 = vpop.xlane.xlu0 %482 }
 0x478   :  { %v484_v27 = vrot.slane %v483_v25, 4 }
 0x47a   :  { %v485_v33 = vadd.f32 %v484_v27, %v483_v25 }
 0x47c   :  { %v486_v38 = vrot.slane %v485_v33, 2 }
 0x47e   :  { %v487_v42 = vadd.f32 %v486_v38, %v485_v33 }
 0x480   :  { %v488_v47 = vrot.slane %v487_v42, 1 }
 0x482   :  { %v489_v53 = vadd.f32 %v488_v47, %v487_v42 }
 0x486   :  { %v683_v29 = vpop.xlane.xlu0 %682 }
 0x487   :  { %v693_v31 = vrot.slane %v683_v29, 4  ;;  %v685_v8 = vmul.f32 0.125, %v683_v29 }
 0x489   :  { %v694_v35 = vadd.f32 %v693_v31, %v683_v29  ;;  %v703_v10 = vsub.f32 %v1551_v18, %v685_v8 }
 0x48b   :  { %v695_v40 = vrot.slane %v694_v35, 2  ;;  %v704_v13 = vsub.f32 %v703_v10, %v692_v11 }
 0x48d   :  { %v696_v45 = vadd.f32 %v695_v40, %v694_v35 }
 0x48f   :  { %v697_v50 = vrot.slane %v696_v45, 1 }
 0x491   :  { %v698_v55 = vadd.f32 %v697_v50, %v696_v45 }
 0x4a3   :  { %s1234_s23 = spop %1233 }
 0x4a4   :  { %s475_s24 = sadd.f32 1.0, %s1234_s23 }
 0x4a6   :  { %v476_v37 = vstv %s475_s24 }
 0x4a7   :  { %1286 = vlog2.f32 %v476_v37 }
 0x4b1   :  { %v1287_v49 = vpop.eup %1286 }
 0x4b2   :  { %v478_v51 = vmul.f32 0.6931472, %v1287_v49 }
 0x4b4   :  { %1235 = vpush %v478_v51 }
 0x4b5   :  { %1237 = vpush %v489_v53 }
 0x4b6   :  { %1239 = vpush %v514_v54 }
 0x4b7   :  { %1241 = vpush %v698_v55 }
 0x4b8   :  { %1243 = vpush %v881_v56 }
 0x4e5   :  { %s1236_s25 = spop %1235 }
 0x4e6   :  { %s480_s26 = sadd.f32 %s1236_s25, %s1556_s21  ;;  %s1238_s27 = spop %1237 }
 0x4e7   :  { %s493_s28 = smul.f32 0.125, %s1238_s27  ;;  %s1240_s2 = spop %1239 }
 0x4e8   :  { %s518_s29 = smul.f32 0.125, %s1240_s2  ;;  %s1242_s1 = spop %1241 }
 0x4e9   :  { %s494_s30 = ssub.f32 %s493_s28, %s480_s26  ;;  %s702_s6 = smul.f32 0.015625, %s1242_s1 }
 0x4ea   :  { %s977_s7 = smul.f32 0.5, %s518_s29  ;;  %s1244_s8 = spop %1243 }
 0x4eb   :  { %s495_s9 = ssub.f32 0.0, %s494_s30  ;;  %v705_v1 = vstv %s702_s6  ;;  %s885_s10 = smul.f32 0.015625, %s1244_s8 }
 0x4ec   :  { %v706_v14 = vadd.f32 %v705_v1, %v704_v13  ;;  %s66_s29 = smul.f32 0.0052083335, %s1532_s16  ;;  %s1342_s8 = scalar_lea.hbm %s1594_s5, 16 }
 0x4ed   :  { %s1564_s11 = sadd.f32 %s977_s7, %s495_s9  ;;  %v888_v16 = vstv %s885_s10  ;;  %p1343_p2 = scmp.ne.s32.totalorder %s1594_s5, %s1342_s8 }
 0x4ee   :  { %v889_v17 = vadd.f32 %v888_v16, %v887_v15  ;;  %v914_v18 = vmul.f32 %v706_v14, %v706_v14  ;;  %p1346_p3 = scmp.lt.u32.totalorder %s1342_s8, %s1594_s5 }
 0x4f0   :  { %v915_v60 = vsel %vm680_vm6, %v914_v18, 0.0  ;;  %v890_v19 = vmul.f32 %v889_v17, %v706_v14  ;;  %v938_v20 = vmul.f32 %v889_v17, %v889_v17  ;;  %p1348_p4 = pnand %p1346_p3, %p1343_p2 }
 0x4f1   :  { %916 = vadd.xlane.f32.xlu1 %v915_v60 }
 0x4f2   :  { %v891_v6 = vsel %vm680_vm6, %v890_v19, 0.0  ;;  %v939_v21 = vsel %vm680_vm6, %v938_v20, 0.0 }
 0x4f3   :  { %892 = vadd.xlane.f32.xlu0 %v891_v6 }
 0x4f7   :  { %940 = vadd.xlane.f32.xlu0 %v939_v21 }
 0x57e   :  { %v917_v29 = vpop.xlane.xlu1 %916 }
 0x57f   :  { %v918_v30 = vrot.slane %v917_v29, 4 }
 0x580   :  { %v893_v22 = vpop.xlane.xlu0 %892 }
 0x581   :  { %v894_v23 = vrot.slane %v893_v22, 4  ;;  %v919_v31 = vadd.f32 %v918_v30, %v917_v29 }
 0x583   :  { %v895_v24 = vadd.f32 %v894_v23, %v893_v22  ;;  %v920_v33 = vrot.slane %v919_v31, 2 }
 0x584   :  { %v941_v42 = vpop.xlane.xlu0 %940 }
 0x585   :  { %v896_v25 = vrot.slane %v895_v24, 2  ;;  %v921_v34 = vadd.f32 %v920_v33, %v919_v31  ;;  %v942_v44 = vrot.slane %v941_v42, 4 }
 0x587   :  { %v897_v26 = vadd.f32 %v896_v25, %v895_v24  ;;  %v922_v36 = vrot.slane %v921_v34, 1  ;;  %v943_v45 = vadd.f32 %v942_v44, %v941_v42 }
 0x589   :  { %v898_v27 = vrot.slane %v897_v26, 1  ;;  %v923_v41 = vadd.f32 %v922_v36, %v921_v34  ;;  %v944_v47 = vrot.slane %v943_v45, 2 }
 0x58b   :  { %v899_v28 = vadd.f32 %v898_v27, %v897_v26  ;;  %v945_v48 = vadd.f32 %v944_v47, %v943_v45 }
 0x58d   :  { %1245 = vpush %v899_v28  ;;  %v946_v50 = vrot.slane %v945_v48, 1 }
 0x58f   :  { %v947_v55 = vadd.f32 %v946_v50, %v945_v48 }
 0x5be   :  { %s1246_s12 = spop %1245 }
 0x5bf   :  { %s903_s13 = smul.f32 0.015625, %s1246_s12 }
 0x5c1   :  { %s904_s15 = smax.f32 %s1367_s14, %s903_s13 }
 0x5c2   :  { %v905_v32 = vstv %s904_s15 }
 0x5c3   :  { %1288 = vrsqrt.f32 %v905_v32  ;;  %vm908_vm9 = vcmp.eq.f32.partialorder %v905_v32, inf  ;;  %v911_v38 = vand.u32 2147483648, %v905_v32  ;;  %vm910_vm10 = vcmp.eq.f32.partialorder %v905_v32, 0.0 }
 0x5cd   :  { %v1289_v35 = vpop.eup %1288 }
 0x5ce   :  { %v907_v37 = vmul.f32 %v1289_v35, %v905_v32 }
 0x5d0   :  { %v909_v39 = vsel %vm908_vm9, %v905_v32, %v907_v37 }
 0x5d1   :  { %v912_v40 = vsel %vm910_vm10, %v911_v38, %v909_v39 }
 0x5d2   :  { %1247 = vpush %v912_v40 }
 0x5d3   :  { %1249 = vpush %v923_v41 }
 0x603   :  { %s1570_s0 = spop %1247 }
 0x604   :  { %s1250_s4 = spop %1249 }
 0x605   :  { %s927_s17 = smul.f32 0.015625, %s1250_s4 }
 0x607   :  { %s928_s18 = smax.f32 %s1367_s14, %s927_s17 }
 0x608   :  { %v929_v46 = vstv %s928_s18 }
 0x609   :  { %1290 = vrsqrt.f32 %v929_v46  ;;  %vm932_vm11 = vcmp.eq.f32.partialorder %v929_v46, inf  ;;  %v935_v52 = vand.u32 2147483648, %v929_v46  ;;  %vm934_vm12 = vcmp.eq.f32.partialorder %v929_v46, 0.0 }
 0x613   :  { %v1291_v49 = vpop.eup %1290 }
 0x614   :  { %v931_v51 = vmul.f32 %v1291_v49, %v929_v46 }
 0x616   :  { %v933_v53 = vsel %vm932_vm11, %v929_v46, %v931_v51 }
 0x617   :  { %v936_v54 = vsel %vm934_vm12, %v935_v52, %v933_v53 }
 0x618   :  { %1251 = vpush %v936_v54 }
 0x619   :  { %1253 = vpush %v947_v55 }
 0x649   :  { %s1252_s19 = spop %1251 }
 0x64a   :  { %s1254_s20 = spop %1253 }
 0x64b   :  { %s951_s21 = smul.f32 0.015625, %s1254_s20 }
 0x64d   :  { %s952_s3 = smax.f32 %s1367_s14, %s951_s21 }
 0x64e   :  { %v953_v56 = vstv %s952_s3 }
 0x64f   :  { %1292 = vrsqrt.f32 %v953_v56  ;;  %vm956_vm13 = vcmp.eq.f32.partialorder %v953_v56, inf  ;;  %v959_v59 = vand.u32 2147483648, %v953_v56  ;;  %vm958_vm14 = vcmp.eq.f32.partialorder %v953_v56, 0.0 }
 0x659   :  { %v1293_v57 = vpop.eup %1292 }
 0x65a   :  { %v955_v58 = vmul.f32 %v1293_v57, %v953_v56 }
 0x65c   :  { %v957_v61 = vsel %vm956_vm13, %v953_v56, %v955_v58 }
 0x65d   :  { %v960_v43 = vsel %vm958_vm14, %v959_v59, %v957_v61 }
 0x65e   :  { %1255 = vpush %v960_v43 }
 0x68f   :  { %s1256_s22 = spop %1255 }
 0x690   :  { %s962_s23 = smul.f32 %s1256_s22, %s1252_s19 }
 0x692   :  { %v963_v0 = vstv %s962_s23 }
 0x693   :  { %1294 = vrsqrt.f32 %v963_v0  ;;  %vm966_vm15 = vcmp.eq.f32.partialorder %v963_v0, inf  ;;  %v969_v4 = vand.u32 2147483648, %v963_v0  ;;  %vm968_vm0 = vcmp.eq.f32.partialorder %v963_v0, 0.0 }
 0x69d   :  { %v1295_v2 = vpop.eup %1294 }
 0x69e   :  { %v965_v3 = vmul.f32 %v1295_v2, %v963_v0 }
 0x6a0   :  { %v967_v5 = vsel %vm966_vm15, %v963_v0, %v965_v3 }
 0x6a1   :  { %v970_v8 = vsel %vm968_vm0, %v969_v4, %v967_v5 }
 0x6a2   :  { %1257 = vpush %v970_v8 }
 0x6d3   :  { %s1258_s24 = spop %1257 }
 0x6d4   :  { %s972_s25 = sadd.f32 1e-08, %s1258_s24 }
 0x6d6   :  { %v973_v62 = vstv %s972_s25 }
 0x6d7   :  { %1296 = vrcp.f32 %v973_v62 }
 0x6e1   :  { %v1297_v7 = vpop.eup %1296 }
 0x6e2   :  { %1259 = vpush %v1297_v7 }
 0x713   :  { %s1260_s26 = spop %1259 }
 0x714   :  { %s976_s27 = smul.f32 %s1260_s26, %s1570_s0 }
 0x716   :  { %s979_s28 = smul.f32 0.3, %s976_s27 }
 0x718   :  { %s980_s2 = sadd.f32 %s979_s28, %s1564_s11 }
 0x71a   :  { %s981_s1 = smul.f32 0.1, %s980_s2 }
 0x71c   :  { %s982_s30 = sadd.f32 %s981_s1, %s66_s29 }
 0x71e   :  { %984 = sst [smem:[#allocation7]] %s982_s30 }
 0x71f   :  { %1351 = shalt.err (!%p1348_p4)
}
 0x720   :  { %s1368_s14 = smov [#allocation7]  }
 0x721   :  { %992 = dma.smem_to_hbm %s1368_s14, 16, %s1594_s5, [#allocation4]  }
 0x722   :  { %1356 = dma.done.wait [#allocation4], 16  }
 0x723   :  { %1357 = vsyncadd [#allocation4], 4294967280 }
 0x724   :  { %996 = sfence }
 0x725   :  { %997 = vsyncpa [#allocation3], 1 }
 0x726   :  { %998 = vsyncpa [#allocation6], 1 }
 0x727   :  { %999 = vsyncpa [#allocation4], 1 }

</bundles_post_ra>
